<compile_context>
chip_gen: v5e
topology: v5e:2x2
jax: 0.10.0
libtpu: 0.0.40
codegen_flags: <defaults>
</compile_context>

<pallas_src>
import jax
import jax.numpy as jnp
from jax import lax
from jax.experimental import pallas as pl
from jax.experimental.pallas import tpu as pltpu

D_IN = 512
D_HID = 256
D_OUT = 1
_BM_MAX = 2048  # 2 x 2048x512 bf16 x-tiles (4 MiB) + W1 + h staging << VMEM


def _pick_bm(batch: int) -> int:
    """Largest batch tile (multiple of 128, preferring multiples of 256) that
    still yields >= 4 grid steps (>= 2 per v7x TensorCore for pipelining)."""
    for bm in (2048, 1536, 1024, 768, 512, 256):
        if batch // bm >= 4:
            return bm
    return 128


def _multidec_kernel(x_ref, w1_ref, b1_ref, w2_ref, b2_ref, o_ref):
    # x_ref:  (BM, 512) bf16 (or f32 fallback)    w1_ref: (512, 256) bf16 (resident)
    # b1_ref: (1, 256) f32    w2_ref: (1, 256) bf16    b2_ref: (1, 1) f32 in SMEM
    # o_ref:  (1, BM) f32  (lane-dense output slab)
    x = x_ref[...]
    if x.dtype != jnp.bfloat16:        # static; no-op on the bf16 fast path
        x = x.astype(jnp.bfloat16)
    w1 = w1_ref[...]
    if w1.dtype != jnp.bfloat16:       # static; wrapper always feeds bf16
        w1 = w1.astype(jnp.bfloat16)
    # Linear1 (bf16 MXU, f32 accumulation) + bias + ReLU (VPU)
    h = jnp.dot(x, w1, preferred_element_type=jnp.float32) + b1_ref[...]
    h = jnp.maximum(h, 0.0)
    w2 = w2_ref[...]
    if w2.dtype != jnp.bfloat16:
        w2 = w2.astype(jnp.bfloat16)
    # Linear2 (256 -> 1) as an NT contraction: (1,256) . (BM,256)^T -> (1, BM),
    # lane-dense result; h goes in as bf16 to halve its VMEM staging traffic.
    y = lax.dot_general(
        w2, h.astype(jnp.bfloat16),
        dimension_numbers=(((1,), (1,)), ((), ())),
        preferred_element_type=jnp.float32,
    )
    o_ref[...] = (y + b2_ref[0, 0]).astype(o_ref.dtype)


def _invoke(x_rows, w1b, b1, w2b, b2, bm, grid_n):
    """Run the fused kernel over the first grid_n*bm rows of x_rows.
    Returns a (1, grid_n*bm) f32 lane-dense slab."""
    out_cols = grid_n * bm
    x_bytes = x_rows.dtype.itemsize
    flops = 2 * out_cols * D_IN * D_HID + 2 * out_cols * D_HID
    bytes_accessed = (x_bytes * out_cols * D_IN          # x tiles
                      + 2 * (D_IN * D_HID + D_HID)       # bf16 W1 + w2 row
                      + 4 * (D_HID + 1 + out_cols))      # b1, b2, output
    return pl.pallas_call(
        _multidec_kernel,
        out_shape=jax.ShapeDtypeStruct((1, out_cols), jnp.float32),
        grid_spec=pltpu.PrefetchScalarGridSpec(
            num_scalar_prefetch=0,
            grid=(grid_n,),
            in_specs=[
                pl.BlockSpec((bm, D_IN), lambda i: (i, 0)),       # x tile
                pl.BlockSpec((D_IN, D_HID), lambda i: (0, 0)),    # W1 (resident)
                pl.BlockSpec((1, D_HID), lambda i: (0, 0)),       # b1
                pl.BlockSpec((1, D_HID), lambda i: (0, 0)),       # w2 row
                pl.BlockSpec(memory_space=pltpu.MemorySpace.SMEM),  # b2 scalar
            ],
            out_specs=pl.BlockSpec((1, bm), lambda i: (0, i)),    # lane-dense out
        ),
        compiler_params=pltpu.CompilerParams(
            dimension_semantics=("parallel",),
            vmem_limit_bytes=32 * 1024 * 1024,
        ),
        cost_estimate=pl.CostEstimate(
            flops=int(flops), transcendentals=0,
            bytes_accessed=int(bytes_accessed)),
    )(x_rows, w1b, b1, w2b, b2)


def _single_tile(x_rows, w1b, b1, w2b, b2):
    """One-block call for a small batch / ragged tail; pads at most 7 rows."""
    r = x_rows.shape[0]
    r8 = 8 * pl.cdiv(r, 8)
    if r8 != r:
        x_rows = jnp.pad(x_rows, ((0, r8 - r), (0, 0)))  # <= 7 padded rows
    out = _invoke(x_rows, w1b, b1, w2b, b2, r8, 1)
    return out[0, :r]


def multidec_forward(x, w1, b1, w2, b2):
    """x: [B, 512] (bf16 preferred, f32 accepted) -> [B, 1] f32.

    w1: [512, 256] (in,out); b1: [1, 256]; w2: [1, 256] (out,in); b2: [1, 1].
    For the full HBM-bandwidth win, keep activations (x) in bf16 upstream —
    the kernel consumes x in whatever dtype it is given.
    """
    B = x.shape[0]
    # One-time weight casts (no-ops if the caller already stores them in bf16);
    # keeps the resident W1 tile bf16 in HBM so it is never re-cast per step.
    w1b = w1.astype(jnp.bfloat16)
    w2b = w2.astype(jnp.bfloat16)

    if B <= 256:
        return _single_tile(x, w1b, b1, w2b, b2).reshape(B, 1)

    bm = _pick_bm(B)
    n_main = B // bm
    rem = B - n_main * bm
    # Main call reads the full x array but only indexes whole in-bounds tiles
    # (no padded copy of x ever materializes in HBM).
    y_main = _invoke(x, w1b, b1, w2b, b2, bm, n_main)[0]
    if rem == 0:
        return y_main.reshape(B, 1)
    # Ragged remainder (< one tile): tiny second call on the tail slice.
    y_tail = _single_tile(x[n_main * bm:], w1b, b1, w2b, b2)
    return jnp.concatenate([y_main, y_tail]).reshape(B, 1)


def init_params(key):
    """Deterministic init matching nn.Linear's default (uniform +-1/sqrt(fan_in))."""
    k1, k2, k3, k4 = jax.random.split(key, 4)
    bound1 = 1.0 / (D_IN ** 0.5)
    bound2 = 1.0 / (D_HID ** 0.5)
    w1 = jax.random.uniform(k1, (D_IN, D_HID), jnp.float32, -bound1, bound1)
    b1 = jax.random.uniform(k2, (1, D_HID), jnp.float32, -bound1, bound1)
    w2 = jax.random.uniform(k3, (D_OUT, D_HID), jnp.float32, -bound2, bound2)
    b2 = jax.random.uniform(k4, (D_OUT, D_OUT), jnp.float32, -bound2, bound2)
    return w1, b1, w2, b2


if __name__ == "__main__":
    key = jax.random.PRNGKey(0)
    kx, kp = jax.random.split(key)
    w1, b1, w2, b2 = init_params(kp)

    # B=8 exercises the single-tile path; B=300 exercises the multi-tile main
    # call (grid=2, bm=128) plus the ragged 44-row tail call.
    for B in (8, 300):
        kb = jax.random.fold_in(kx, B)
        x = jax.random.normal(kb, (B, D_IN), jnp.float32)
        # Production path: activations kept in bf16 upstream (halves x DMA,
        # removes every in-kernel cast).
        xb = x.astype(jnp.bfloat16)

        out = jax.block_until_ready(multidec_forward(xb, w1, b1, w2, b2))

        # Reference in plain JAX (same math as the PyTorch forward), from the
        # same bf16 activations; tolerance covers bf16 MXU inputs / bf16 h.
        xf = xb.astype(jnp.float32)
        ref = jnp.maximum(xf @ w1 + b1, 0.0) @ w2.T + b2
        assert out.shape == (B, 1)
        max_err = float(jnp.max(jnp.abs(out - ref)))
        assert jnp.allclose(out, ref, atol=2e-2, rtol=2e-2), max_err

    print("KERNEL_OK")
</pallas_src>

<mosaic_0001>
module attributes {stable_mosaic.version = 11 : i64} {
  func.func @_multidec_kernel(%arg0: i32, %arg1: memref<8x512xbf16, #tpu.memory_space<vmem>>, %arg2: memref<512x256xbf16, #tpu.memory_space<vmem>>, %arg3: memref<1x256xf32, #tpu.memory_space<vmem>>, %arg4: memref<1x256xbf16, #tpu.memory_space<vmem>>, %arg5: memref<1x1xf32, #tpu.memory_space<smem>>, %arg6: memref<1x8xf32, #tpu.memory_space<vmem>>) attributes {dimension_semantics = [#tpu.dimension_semantics<parallel>], iteration_bounds = array<i64: 1>, scalar_prefetch = 0 : i64, scratch_operands = 0 : i64, tpu.core_type = #tpu.core_type<tc>, window_params = [{transform_indices = @transform_0, window_bounds = array<i64: 8, 512>}, {pipeline_mode = #tpu.pipeline_mode<synchronous>, transform_indices = @transform_1, window_bounds = array<i64: 512, 256>}, {pipeline_mode = #tpu.pipeline_mode<synchronous>, transform_indices = @transform_2, window_bounds = array<i64: 1, 256>}, {pipeline_mode = #tpu.pipeline_mode<synchronous>, transform_indices = @transform_3, window_bounds = array<i64: 1, 256>}, {transform_indices = @transform_4, window_bounds = array<i64: 1, 1>}, {transform_indices = @transform_5, window_bounds = array<i64: 1, 8>}]} {
    %c0 = arith.constant 0 : index
    %c0_0 = arith.constant 0 : index
    %0 = vector.load %arg1[%c0, %c0_0] : memref<8x512xbf16, #tpu.memory_space<vmem>>, vector<8x512xbf16>
    %c0_1 = arith.constant 0 : index
    %c0_2 = arith.constant 0 : index
    %1 = vector.load %arg2[%c0_1, %c0_2] : memref<512x256xbf16, #tpu.memory_space<vmem>>, vector<512x256xbf16>
    %cst = arith.constant dense<0.000000e+00> : vector<8x256xf32>
    %2 = tpu.matmul %0, %1, %cst {dimension_numbers = #tpu.dot_dimension_numbers<[1], [0], [0], [1], [0, 0, 1, 1], [], []>} : vector<8x512xbf16>, vector<512x256xbf16>, vector<8x256xf32> -> vector<8x256xf32>
    %c0_3 = arith.constant 0 : index
    %c0_4 = arith.constant 0 : index
    %3 = vector.load %arg3[%c0_3, %c0_4] : memref<1x256xf32, #tpu.memory_space<vmem>>, vector<1x256xf32>
    %4 = vector.broadcast %3 : vector<1x256xf32> to vector<8x256xf32>
    %5 = arith.addf %2, %4 : vector<8x256xf32>
    %cst_5 = arith.constant 0.000000e+00 : f32
    %6 = vector.broadcast %cst_5 : f32 to vector<8x256xf32>
    %7 = arith.maximumf %5, %6 : vector<8x256xf32>
    %c0_6 = arith.constant 0 : index
    %c0_7 = arith.constant 0 : index
    %8 = vector.load %arg4[%c0_6, %c0_7] : memref<1x256xbf16, #tpu.memory_space<vmem>>, vector<1x256xbf16>
    %9 = arith.truncf %7 : vector<8x256xf32> to vector<8x256xbf16>
    %cst_8 = arith.constant dense<0.000000e+00> : vector<1x8xf32>
    %10 = tpu.matmul %8, %9, %cst_8 {dimension_numbers = #tpu.dot_dimension_numbers<[1], [1], [0], [0], [0, 0, 1, 0], [], []>} : vector<1x256xbf16>, vector<8x256xbf16>, vector<1x8xf32> -> vector<1x8xf32>
    %c0_9 = arith.constant 0 : index
    %c0_10 = arith.constant 0 : index
    %11 = memref.load %arg5[%c0_9, %c0_10] : memref<1x1xf32, #tpu.memory_space<smem>>
    %12 = vector.broadcast %11 : f32 to vector<1x8xf32>
    %13 = arith.addf %10, %12 : vector<1x8xf32>
    %c0_11 = arith.constant 0 : index
    %c0_12 = arith.constant 0 : index
    %14 = vector.load %arg6[%c0_11, %c0_12] : memref<1x8xf32, #tpu.memory_space<vmem>>, vector<1x8xf32>
    tpu.vector_store %arg6[%c0_11, %c0_12], %13 {strides = array<i32>} : memref<1x8xf32, #tpu.memory_space<vmem>>, vector<1x8xf32>,
    return
  }
  func.func @transform_0(%arg0: i32) -> (i32, i32) {
    %c0_i32 = arith.constant 0 : i32
    %c0_i32_0 = arith.constant 0 : i32
    return %arg0, %c0_i32 : i32, i32
  }
  func.func @transform_1(%arg0: i32) -> (i32, i32) {
    %c0_i32 = arith.constant 0 : i32
    %c0_i32_0 = arith.constant 0 : i32
    %c0_i32_1 = arith.constant 0 : i32
    return %c0_i32, %c0_i32_0 : i32, i32
  }
  func.func @transform_2(%arg0: i32) -> (i32, i32) {
    %c0_i32 = arith.constant 0 : i32
    %c0_i32_0 = arith.constant 0 : i32
    %c0_i32_1 = arith.constant 0 : i32
    return %c0_i32, %c0_i32_0 : i32, i32
  }
  func.func @transform_3(%arg0: i32) -> (i32, i32) {
    %c0_i32 = arith.constant 0 : i32
    %c0_i32_0 = arith.constant 0 : i32
    %c0_i32_1 = arith.constant 0 : i32
    return %c0_i32, %c0_i32_0 : i32, i32
  }
  func.func @transform_4(%arg0: i32) -> (i32, i32) {
    %c0_i32 = arith.constant 0 : i32
    %c0_i32_0 = arith.constant 0 : i32
    %c0_i32_1 = arith.constant 0 : i32
    return %c0_i32, %c0_i32_0 : i32, i32
  }
  func.func @transform_5(%arg0: i32) -> (i32, i32) {
    %c0_i32 = arith.constant 0 : i32
    %c0_i32_0 = arith.constant 0 : i32
    return %c0_i32, %arg0 : i32, i32
  }
}

</mosaic_0001>

<bundles_post_ra>
// kernel: tpu_custom_call.1
= control target key start
LH: loop header
LB: loop body
LE: loop exit
PB: predicated region body
PF: predicated region fallthrough
CT: control target
= control target key end

     0   :  { %11 = vsyncpa [#allocation4], 0  ;;  %s1094_s0 = inlined_call_operand.hbm [shape: bf16[8,512], index: 0, kind: input, shape index: {}]   ;;  %s1095_s1 = inlined_call_operand.hbm [shape: bf16[512,256], index: 1, kind: input, shape index: {}]   ;;  %s1096_s2 = inlined_call_operand.vmem [shape: f32[1,256], index: 2, kind: input, shape index: {}]   ;;  %s1097_s3 = inlined_call_operand.vmem [shape: bf16[1,256], index: 3, kind: input, shape index: {}]   ;;  %s1098_s4 = inlined_call_operand.<no memory space> [shape: f32[1,1], index: 4, kind: input, shape index: {}]   ;;  %s1099_s5 = inlined_call_operand.hbm [shape: f32[1,8], index: 5, kind: output, shape index: {}]  }
   0x1   :  { %12 = vsyncpa [#allocation7], 0 }
   0x2   :  { %13 = vsyncpa [#allocation5], 0  ;;  %s19_s20 = sshll.u32 %s1094_s0, 4  ;;  %s1025_s21 = smov [#allocation3]   ;;  %s20_s20 = int_to_ptr.hbm [resolvable:$true] %s19_s20 }
   0x3   :  { %s21_s22 = sshll.u32 %s1025_s21, 4  ;;  %s29_s25 = sshll.u32 %s1095_s1, 4  ;;  %s22_s22 = int_to_ptr.vmem [resolvable:$true] %s21_s22  ;;  %s30_s25 = int_to_ptr.hbm [resolvable:$true] %s29_s25 }
   0x4   :  { %24 = dma.hbm_to_vmem [thread:$0]  %s20_s20, 256, %s22_s22, [#allocation4]  }
   0x5   :  { %s1026_s26 = smov [#allocation6]   ;;  %s1027_s28 = smov 128  }
   0x6   :  { %s31_s27 = sshll.u32 %s1026_s26, 4  ;;  %s1028_s29 = smov 8   ;;  %s32_s27 = int_to_ptr.vmem [resolvable:$true] %s31_s27 }
   0x7   :  { %37 = dma.hbm_to_vmem [thread:$0]  %s30_s25, 8192, %s32_s27, [#allocation7], %s1027_s28, %s1027_s28, %s1028_s29  }
   0x8   :  { %1019 = dma.done.wait [#allocation4], 256  }
   0x9   :  { %1020 = vsyncadd [#allocation4], 4294967040 }
   0xa   :  { %1021 = dma.done.wait [#allocation7], 8192  }
   0xb   :  { %1022 = vsyncadd [#allocation7], 4294959104  ;;  %v680_v0 = vld [vmem:[#allocation6 + $0x70] sm:$0xf]  ;;  %v893_v1 = vld [vmem:[#allocation6 + $0x74] sm:$0xf0] }
   0xc   :  { %v744_v2 = vld [vmem:[#allocation6 + $0xf0] sm:$0xf]  ;;  %v681_v3 = vor.u32 %v893_v1, %v680_v0  ;;  %v909_v4 = vld [vmem:[#allocation6 + $0xf4] sm:$0xf0]  ;;  %v672_v11 = vld [vmem:[#allocation6 + $0x60] sm:$0xf] }
   0xd   :  { %v808_v5 = vld [vmem:[#allocation6 + $0x170] sm:$0xf]  ;;  %v925_v6 = vld [vmem:[#allocation6 + $0x174] sm:$0xf0]  ;;  %v745_v7 = vor.u32 %v909_v4, %v744_v2  ;;  %v891_v13 = vld [vmem:[#allocation6 + $0x64] sm:$0xf0] }
   0xe   :  { %v809_v8 = vor.u32 %v925_v6, %v808_v5  ;;  %v872_v9 = vld [vmem:[#allocation6 + $0x1f0] sm:$0xf]  ;;  %v941_v10 = vld [vmem:[#allocation6 + $0x1f4] sm:$0xf0]  ;;  %459 = vmatpush.bf16.msra.mxu0 %v681_v3  ;;  %v736_v14 = vld [vmem:[#allocation6 + $0xe0] sm:$0xf]  ;;  %v673_v16 = vor.u32 %v891_v13, %v672_v11 }
   0xf   :  { %v873_v12 = vor.u32 %v941_v10, %v872_v9  ;;  %v907_v15 = vld [vmem:[#allocation6 + $0xe4] sm:$0xf0]  ;;  %472 = vmatpush.bf16.msra.mxu1 %v745_v7  ;;  %v800_v18 = vld [vmem:[#allocation6 + $0x160] sm:$0xf]  ;;  %v664_v23 = vld [vmem:[#allocation6 + $0x50] sm:$0xf] }
  0x10   :  { %485 = vmatpush.bf16.msra.mxu2 %v809_v8  ;;  %v737_v17 = vor.u32 %v907_v15, %v736_v14  ;;  %v923_v19 = vld [vmem:[#allocation6 + $0x164] sm:$0xf0]  ;;  %v864_v20 = vld [vmem:[#allocation6 + $0x1e0] sm:$0xf]  ;;  %v889_v24 = vld [vmem:[#allocation6 + $0x54] sm:$0xf0] }
  0x11   :  { %498 = vmatpush.bf16.msra.mxu3 %v873_v12  ;;  %v801_v21 = vor.u32 %v923_v19, %v800_v18  ;;  %v939_v22 = vld [vmem:[#allocation6 + $0x1e4] sm:$0xf0]  ;;  %v728_v26 = vld [vmem:[#allocation6 + $0xd0] sm:$0xf]  ;;  %v905_v27 = vld [vmem:[#allocation6 + $0xd4] sm:$0xf0]  ;;  %v665_v29 = vor.u32 %v889_v24, %v664_v23 }
  0x12   :  { %v865_v25 = vor.u32 %v939_v22, %v864_v20  ;;  %v792_v28 = vld [vmem:[#allocation6 + $0x150] sm:$0xf]  ;;  %460 = vmatpush.bf16.msra.mxu0 %v673_v16  ;;  %v921_v30 = vld [vmem:[#allocation6 + $0x154] sm:$0xf0]  ;;  %v729_v33 = vor.u32 %v905_v27, %v728_v26  ;;  %v656_v35 = vld [vmem:[#allocation6 + $0x40] sm:$0xf] }
  0x13   :  { %v856_v31 = vld [vmem:[#allocation6 + $0x1d0] sm:$0xf]  ;;  %v937_v32 = vld [vmem:[#allocation6 + $0x1d4] sm:$0xf0]  ;;  %473 = vmatpush.bf16.msra.mxu1 %v737_v17  ;;  %v793_v34 = vor.u32 %v921_v30, %v792_v28  ;;  %v887_v36 = vld [vmem:[#allocation6 + $0x44] sm:$0xf0] }
  0x14   :  { %486 = vmatpush.bf16.msra.mxu2 %v801_v21  ;;  %v720_v37 = vld [vmem:[#allocation6 + $0xc0] sm:$0xf]  ;;  %v857_v38 = vor.u32 %v937_v32, %v856_v31  ;;  %v903_v39 = vld [vmem:[#allocation6 + $0xc4] sm:$0xf0]  ;;  %v657_v44 = vor.u32 %v887_v36, %v656_v35  ;;  %v648_v47 = vld [vmem:[#allocation6 + $0x30] sm:$0xf] }
  0x15   :  { %499 = vmatpush.bf16.msra.mxu3 %v865_v25  ;;  %v784_v40 = vld [vmem:[#allocation6 + $0x140] sm:$0xf]  ;;  %v919_v41 = vld [vmem:[#allocation6 + $0x144] sm:$0xf0]  ;;  %v721_v45 = vor.u32 %v903_v39, %v720_v37  ;;  %v885_v48 = vld [vmem:[#allocation6 + $0x34] sm:$0xf0] }
  0x16   :  { %v848_v42 = vld [vmem:[#allocation6 + $0x1c0] sm:$0xf]  ;;  %v935_v43 = vld [vmem:[#allocation6 + $0x1c4] sm:$0xf0]  ;;  %461 = vmatpush.bf16.msra.mxu0 %v665_v29  ;;  %v785_v46 = vor.u32 %v919_v41, %v784_v40  ;;  %v712_v49 = vld [vmem:[#allocation6 + $0xb0] sm:$0xf]  ;;  %v649_v56 = vor.u32 %v885_v48, %v648_v47 }
  0x17   :  { %474 = vmatpush.bf16.msra.mxu1 %v729_v33  ;;  %v849_v50 = vor.u32 %v935_v43, %v848_v42  ;;  %v901_v51 = vld [vmem:[#allocation6 + $0xb4] sm:$0xf0]  ;;  %v776_v52 = vld [vmem:[#allocation6 + $0x130] sm:$0xf]  ;;  %v640_v59 = vld [vmem:[#allocation6 + $0x20] sm:$0xf] }
  0x18   :  { %487 = vmatpush.bf16.msra.mxu2 %v793_v34  ;;  %v917_v53 = vld [vmem:[#allocation6 + $0x134] sm:$0xf0]  ;;  %v840_v54 = vld [vmem:[#allocation6 + $0x1b0] sm:$0xf]  ;;  %v713_v57 = vor.u32 %v901_v51, %v712_v49  ;;  %v883_v60 = vld [vmem:[#allocation6 + $0x24] sm:$0xf0] }
  0x19   :  { %500 = vmatpush.bf16.msra.mxu3 %v857_v38  ;;  %v933_v55 = vld [vmem:[#allocation6 + $0x1b4] sm:$0xf0]  ;;  %v777_v58 = vor.u32 %v917_v53, %v776_v52  ;;  %v704_v61 = vld [vmem:[#allocation6 + $0xa0] sm:$0xf]  ;;  %v899_v63 = vld [vmem:[#allocation6 + $0xa4] sm:$0xf0]  ;;  %v641_v4 = vor.u32 %v883_v60, %v640_v59 }
  0x1a   :  { %462 = vmatpush.bf16.msra.mxu0 %v657_v44  ;;  %v841_v62 = vor.u32 %v933_v55, %v840_v54  ;;  %v768_v0 = vld [vmem:[#allocation6 + $0x120] sm:$0xf]  ;;  %v915_v1 = vld [vmem:[#allocation6 + $0x124] sm:$0xf0]  ;;  %v705_v5 = vor.u32 %v899_v63, %v704_v61  ;;  %v632_v7 = vld [vmem:[#allocation6 + $0x10] sm:$0xf] }
  0x1b   :  { %475 = vmatpush.bf16.msra.mxu1 %v721_v45  ;;  %v832_v2 = vld [vmem:[#allocation6 + $0x1a0] sm:$0xf]  ;;  %v931_v3 = vld [vmem:[#allocation6 + $0x1a4] sm:$0xf0]  ;;  %v769_v6 = vor.u32 %v915_v1, %v768_v0  ;;  %v881_v8 = vld [vmem:[#allocation6 + $0x14] sm:$0xf0] }
  0x1c   :  { %488 = vmatpush.bf16.msra.mxu2 %v785_v46  ;;  %v696_v9 = vld [vmem:[#allocation6 + $0x90] sm:$0xf]  ;;  %v833_v10 = vor.u32 %v931_v3, %v832_v2  ;;  %v897_v11 = vld [vmem:[#allocation6 + $0x94] sm:$0xf0]  ;;  %v633_v16 = vor.u32 %v881_v8, %v632_v7  ;;  %v624_v17 = vld [vmem:[#allocation6] sm:$0xf] }
  0x1d   :  { %501 = vmatpush.bf16.msra.mxu3 %v849_v50  ;;  %v760_v12 = vld [vmem:[#allocation6 + $0x110] sm:$0xf]  ;;  %v913_v13 = vld [vmem:[#allocation6 + $0x114] sm:$0xf0]  ;;  %v879_v18 = vld [vmem:[#allocation6 + $0x4] sm:$0xf0]  ;;  %v697_v20 = vor.u32 %v897_v11, %v696_v9 }
  0x1e   :  { %463 = vmatpush.bf16.msra.mxu0 %v649_v56  ;;  %v824_v14 = vld [vmem:[#allocation6 + $0x190] sm:$0xf]  ;;  %v929_v15 = vld [vmem:[#allocation6 + $0x194] sm:$0xf0]  ;;  %v688_v19 = vld [vmem:[#allocation6 + $0x80] sm:$0xf]  ;;  %v761_v21 = vor.u32 %v913_v13, %v760_v12  ;;  %v625_v32 = vor.u32 %v879_v18, %v624_v17 }
  0x1f   :  { %476 = vmatpush.bf16.msra.mxu1 %v713_v57  ;;  %v895_v22 = vld [vmem:[#allocation6 + $0x84] sm:$0xf0]  ;;  %v752_v23 = vld [vmem:[#allocation6 + $0x100] sm:$0xf]  ;;  %v825_v25 = vor.u32 %v929_v15, %v824_v14  ;;  %v892_v28 = vld [vmem:[#allocation6 + $0x74] sm:$0xf] }
  0x20   :  { %489 = vmatpush.bf16.msra.mxu2 %v777_v58  ;;  %v911_v24 = vld [vmem:[#allocation6 + $0x104] sm:$0xf0]  ;;  %v816_v26 = vld [vmem:[#allocation6 + $0x180] sm:$0xf]  ;;  %v682_v29 = vld [vmem:[#allocation6 + $0x78] sm:$0xf0]  ;;  %v689_v37 = vor.u32 %v895_v22, %v688_v19 }
  0x21   :  { %502 = vmatpush.bf16.msra.mxu3 %v841_v62  ;;  %v927_v27 = vld [vmem:[#allocation6 + $0x184] sm:$0xf0]  ;;  %v908_v30 = vld [vmem:[#allocation6 + $0xf4] sm:$0xf]  ;;  %v54_v31 = vld [vmem:[#allocation3 + $0x8] sm:$0xff]  ;;  %v753_v38 = vor.u32 %v911_v24, %v752_v23  ;;  %v685_v43 = vor.u32 %v892_v28, %v682_v29  ;;  %s1029_s7 = smov [#allocation8]  }
  0x22   :  { %464 = vmatpush.bf16.msra.mxu0 %v641_v4  ;;  %v746_v33 = vld [vmem:[#allocation6 + $0xf8] sm:$0xf0]  ;;  %v924_v34 = vld [vmem:[#allocation6 + $0x174] sm:$0xf]  ;;  %v129_v36 = vunpack.c.l.b16 %v54_v31  ;;  %v130_v41 = vunpack.c.h.b16 %v54_v31  ;;  %v817_v42 = vor.u32 %v927_v27, %v816_v26  ;;  %v890_v47 = vld [vmem:[#allocation6 + $0x64] sm:$0xf] }
  0x23   :  { %477 = vmatpush.bf16.msra.mxu1 %v705_v5  ;;  %v810_v35 = vld [vmem:[#allocation6 + $0x178] sm:$0xf0]  ;;  %v940_v39 = vld [vmem:[#allocation6 + $0x1f4] sm:$0xf]  ;;  %v749_v45 = vor.u32 %v908_v30, %v746_v33  ;;  %v674_v48 = vld [vmem:[#allocation6 + $0x68] sm:$0xf0] }
  0x24   :  { %490 = vmatpush.bf16.msra.mxu2 %v769_v6  ;;  %v874_v40 = vld [vmem:[#allocation6 + $0x1f8] sm:$0xf0]  ;;  %v53_v44 = vld [vmem:[#allocation3] sm:$0xff]  ;;  %v813_v46 = vor.u32 %v924_v34, %v810_v35  ;;  %v906_v49 = vld [vmem:[#allocation6 + $0xe4] sm:$0xf]  ;;  %v1066_v56 = vpack.c.b16 %v129_v36, %v129_v36  ;;  %v1070_v60 = vpack.c.b16 %v130_v41, %v130_v41  ;;  %v677_v61 = vor.u32 %v890_v47, %v674_v48  ;;  %s609_s8 = sshll.u32 %s1029_s7, 4  ;;  %s610_s8 = int_to_ptr.vmem [resolvable:$true] %s609_s8 }
  0x25   :  { %503 = vmatpush.bf16.msra.mxu3 %v833_v10  ;;  %v127_v50 = vunpack.c.l.b16 %v53_v44  ;;  %v128_v51 = vunpack.c.h.b16 %v53_v44  ;;  %v877_v52 = vor.u32 %v940_v39, %v874_v40  ;;  %v738_v53 = vld [vmem:[#allocation6 + $0xe8] sm:$0xf0]  ;;  %v922_v54 = vld [vmem:[#allocation6 + $0x164] sm:$0xf]  ;;  %v888_v1 = vld [vmem:[#allocation6 + $0x54] sm:$0xf] }
  0x26   :  { %465 = vmatpush.bf16.msra.mxu0 %v633_v16  ;;  %v802_v55 = vld [vmem:[#allocation6 + $0x168] sm:$0xf0]  ;;  %v938_v57 = vld [vmem:[#allocation6 + $0x1e4] sm:$0xf]  ;;  %v741_v63 = vor.u32 %v906_v49, %v738_v53  ;;  %v666_v2 = vld [vmem:[#allocation6 + $0x58] sm:$0xf0] }
  0x27   :  { %478 = vmatpush.bf16.msra.mxu1 %v697_v20  ;;  %v866_v58 = vld [vmem:[#allocation6 + $0x1e8] sm:$0xf0]  ;;  %v1068_v59 = vpack.c.b16 %v127_v50, %v127_v50  ;;  %v1072_v62 = vpack.c.b16 %v128_v51, %v128_v51  ;;  %v805_v0 = vor.u32 %v922_v54, %v802_v55  ;;  %v904_v3 = vld [vmem:[#allocation6 + $0xd4] sm:$0xf]  ;;  %v730_v5 = vld [vmem:[#allocation6 + $0xd8] sm:$0xf0]  ;;  %v669_v10 = vor.u32 %v888_v1, %v666_v2 }
  0x28   :  { %491 = vmatpush.bf16.msra.mxu2 %v761_v21  ;;  %v869_v4 = vor.u32 %v938_v57, %v866_v58  ;;  %v920_v6 = vld [vmem:[#allocation6 + $0x154] sm:$0xf]  ;;  %v794_v7 = vld [vmem:[#allocation6 + $0x158] sm:$0xf0]  ;;  %v733_v11 = vor.u32 %v904_v3, %v730_v5  ;;  %v886_v13 = vld [vmem:[#allocation6 + $0x44] sm:$0xf] }
  0x29   :  { %504 = vmatpush.bf16.msra.mxu3 %v825_v25  ;;  %v936_v8 = vld [vmem:[#allocation6 + $0x1d4] sm:$0xf]  ;;  %v858_v9 = vld [vmem:[#allocation6 + $0x1d8] sm:$0xf0]  ;;  %v797_v12 = vor.u32 %v920_v6, %v794_v7  ;;  %v658_v14 = vld [vmem:[#allocation6 + $0x48] sm:$0xf0] }
  0x2a   :  { %466 = vmatpush.bf16.msra.mxu0 %v625_v32  ;;  %v902_v15 = vld [vmem:[#allocation6 + $0xc4] sm:$0xf]  ;;  %v861_v16 = vor.u32 %v936_v8, %v858_v9  ;;  %v722_v17 = vld [vmem:[#allocation6 + $0xc8] sm:$0xf0]  ;;  %v661_v22 = vor.u32 %v886_v13, %v658_v14  ;;  %v884_v25 = vld [vmem:[#allocation6 + $0x34] sm:$0xf] }
  0x2b   :  { %479 = vmatpush.bf16.msra.mxu1 %v689_v37  ;;  %v918_v18 = vld [vmem:[#allocation6 + $0x144] sm:$0xf]  ;;  %v786_v19 = vld [vmem:[#allocation6 + $0x148] sm:$0xf0]  ;;  %v725_v23 = vor.u32 %v902_v15, %v722_v17  ;;  %v650_v26 = vld [vmem:[#allocation6 + $0x38] sm:$0xf0] }
  0x2c   :  { %492 = vmatpush.bf16.msra.mxu2 %v753_v38  ;;  %v934_v20 = vld [vmem:[#allocation6 + $0x1c4] sm:$0xf]  ;;  %v850_v21 = vld [vmem:[#allocation6 + $0x1c8] sm:$0xf0]  ;;  %v789_v24 = vor.u32 %v918_v18, %v786_v19  ;;  %v900_v27 = vld [vmem:[#allocation6 + $0xb4] sm:$0xf]  ;;  %v653_v34 = vor.u32 %v884_v25, %v650_v26 }
  0x2d   :  { %505 = vmatpush.bf16.msra.mxu3 %v817_v42  ;;  %467 = vmatmul.bf16.vlgmr.msra.gmra.mxu0 %v1068_v59  ;;  %v853_v28 = vor.u32 %v934_v20, %v850_v21  ;;  %v714_v29 = vld [vmem:[#allocation6 + $0xb8] sm:$0xf0]  ;;  %v916_v30 = vld [vmem:[#allocation6 + $0x134] sm:$0xf]  ;;  %v882_v37 = vld [vmem:[#allocation6 + $0x24] sm:$0xf] }
  0x2e   :  { %511 = vmatpush.bf16.msrb.mxu0 %v685_v43  ;;  %480 = vmatmul.bf16.vlgmr.msra.gmra.mxu1 %v1072_v62  ;;  %v778_v31 = vld [vmem:[#allocation6 + $0x138] sm:$0xf0]  ;;  %v932_v32 = vld [vmem:[#allocation6 + $0x1b4] sm:$0xf]  ;;  %v717_v35 = vor.u32 %v900_v27, %v714_v29  ;;  %v642_v38 = vld [vmem:[#allocation6 + $0x28] sm:$0xf0] }
  0x2f   :  { %524 = vmatpush.bf16.msrb.mxu1 %v749_v45  ;;  %493 = vmatmul.bf16.vlgmr.msra.gmra.mxu2 %v1066_v56  ;;  %v842_v33 = vld [vmem:[#allocation6 + $0x1b8] sm:$0xf0]  ;;  %v781_v36 = vor.u32 %v916_v30, %v778_v31  ;;  %v898_v39 = vld [vmem:[#allocation6 + $0xa4] sm:$0xf]  ;;  %v706_v41 = vld [vmem:[#allocation6 + $0xa8] sm:$0xf0] }
  0x30   :  { %537 = vmatpush.bf16.msrb.mxu2 %v813_v46  ;;  %506 = vmatmul.bf16.vlgmr.msra.gmra.mxu3 %v1070_v60  ;;  %v845_v40 = vor.u32 %v932_v32, %v842_v33  ;;  %v914_v42 = vld [vmem:[#allocation6 + $0x124] sm:$0xf]  ;;  %v770_v43 = vld [vmem:[#allocation6 + $0x128] sm:$0xf0]  ;;  %v645_v46 = vor.u32 %v882_v37, %v642_v38  ;;  %v709_v47 = vor.u32 %v898_v39, %v706_v41  ;;  %v880_v49 = vld [vmem:[#allocation6 + $0x14] sm:$0xf] }
  0x31   :  { %550 = vmatpush.bf16.msrb.mxu3 %v877_v52  ;;  %v930_v44 = vld [vmem:[#allocation6 + $0x1a4] sm:$0xf]  ;;  %v834_v45 = vld [vmem:[#allocation6 + $0x1a8] sm:$0xf0]  ;;  %v773_v48 = vor.u32 %v914_v42, %v770_v43  ;;  %v634_v50 = vld [vmem:[#allocation6 + $0x18] sm:$0xf0] }
  0x32   :  { %512 = vmatpush.bf16.msrb.mxu0 %v677_v61  ;;  %v896_v51 = vld [vmem:[#allocation6 + $0x94] sm:$0xf]  ;;  %v837_v52 = vor.u32 %v930_v44, %v834_v45  ;;  %v698_v53 = vld [vmem:[#allocation6 + $0x98] sm:$0xf0]  ;;  %v637_v61 = vor.u32 %v880_v49, %v634_v50  ;;  %v878_v1 = vld [vmem:[#allocation6 + $0x4] sm:$0xf] }
  0x33   :  { %525 = vmatpush.bf16.msrb.mxu1 %v741_v63  ;;  %v912_v54 = vld [vmem:[#allocation6 + $0x114] sm:$0xf]  ;;  %v762_v55 = vld [vmem:[#allocation6 + $0x118] sm:$0xf0]  ;;  %v701_v63 = vor.u32 %v896_v51, %v698_v53  ;;  %v626_v2 = vld [vmem:[#allocation6 + $0x8] sm:$0xf0] }
  0x34   :  { %538 = vmatpush.bf16.msrb.mxu2 %v805_v0  ;;  %v928_v57 = vld [vmem:[#allocation6 + $0x194] sm:$0xf]  ;;  %v826_v58 = vld [vmem:[#allocation6 + $0x198] sm:$0xf0]  ;;  %v765_v0 = vor.u32 %v912_v54, %v762_v55  ;;  %v894_v3 = vld [vmem:[#allocation6 + $0x84] sm:$0xf] }
  0x35   :  { %551 = vmatpush.bf16.msrb.mxu3 %v869_v4  ;;  %v829_v4 = vor.u32 %v928_v57, %v826_v58  ;;  %v690_v5 = vld [vmem:[#allocation6 + $0x88] sm:$0xf0]  ;;  %v910_v6 = vld [vmem:[#allocation6 + $0x104] sm:$0xf]  ;;  %v119_v14 = vld [vmem:[%s1096_s2] sm:$0x3] }
  0x36   :  { %513 = vmatpush.bf16.msrb.mxu0 %v669_v10  ;;  %v754_v7 = vld [vmem:[#allocation6 + $0x108] sm:$0xf0]  ;;  %v926_v8 = vld [vmem:[#allocation6 + $0x184] sm:$0xf]  ;;  %v629_v10 = vor.u32 %v878_v1, %v626_v2  ;;  %v121_v15 = vperm.slane %v119_v14, 0  ;;  %s611_s11 = sshll.u32 %s1099_s5, 4  ;;  %s612_s11 = int_to_ptr.hbm [resolvable:$true] %s611_s11 }
  0x37   :  { %526 = vmatpush.bf16.msrb.mxu1 %v733_v11  ;;  %v818_v9 = vld [vmem:[#allocation6 + $0x188] sm:$0xf0]  ;;  %v693_v11 = vor.u32 %v894_v3, %v690_v5  ;;  %v565_v20 = vld [vmem:[%s1097_s3] sm:$0x3]  ;;  %vm602_vm0 = vcmask 57344  }
  0x38   :  { %539 = vmatpush.bf16.msrb.mxu2 %v797_v12  ;;  %v757_v12 = vor.u32 %v910_v6, %v754_v7  ;;  %v821_v13 = vor.u32 %v926_v8, %v818_v9  ;;  %571 = vst [vmem:[#allocation1] ss:$9 sm:$0xff] %v565_v20 }
  0x39   :  { %552 = vmatpush.bf16.msrb.mxu3 %v861_v16 }
  0x3a   :  { %514 = vmatpush.bf16.msrb.mxu0 %v661_v22 }
  0x3b   :  { %527 = vmatpush.bf16.msrb.mxu1 %v725_v23 }
  0x3c   :  { %540 = vmatpush.bf16.msrb.mxu2 %v789_v24 }
  0x3d   :  { %553 = vmatpush.bf16.msrb.mxu3 %v853_v28  ;;  %v122_v28 = vperm.slane %v119_v14, 1 }
  0x3e   :  { %515 = vmatpush.bf16.msrb.mxu0 %v653_v34 }
  0x3f   :  { %528 = vmatpush.bf16.msrb.mxu1 %v717_v35  ;;  %v572_v27 = vld [vmem:[#allocation1] sm:$0xff]  ;;  %v573_v43 = vld [vmem:[#allocation1 + $0x9] sm:$0xff] }
  0x40   :  { %541 = vmatpush.bf16.msrb.mxu2 %v781_v36 }
  0x41   :  { %554 = vmatpush.bf16.msrb.mxu3 %v845_v40 }
  0x42   :  { %516 = vmatpush.bf16.msrb.mxu0 %v645_v46  ;;  %v569_v46 = vstv %s1098_s4 }
  0x43   :  { %529 = vmatpush.bf16.msrb.mxu1 %v709_v47 }
  0x44   :  { %542 = vmatpush.bf16.msrb.mxu2 %v773_v48 }
  0x45   :  { %555 = vmatpush.bf16.msrb.mxu3 %v837_v52 }
  0x46   :  { %517 = vmatpush.bf16.msrb.mxu0 %v637_v61 }
  0x47   :  { %530 = vmatpush.bf16.msrb.mxu1 %v701_v63 }
  0x48   :  { %543 = vmatpush.bf16.msrb.mxu2 %v765_v0 }
  0x49   :  { %556 = vmatpush.bf16.msrb.mxu3 %v829_v4 }
  0x4a   :  { %518 = vmatpush.bf16.msrb.mxu0 %v629_v10 }
  0x4b   :  { %531 = vmatpush.bf16.msrb.mxu1 %v693_v11 }
  0x4c   :  { %544 = vmatpush.bf16.msrb.mxu2 %v757_v12 }
  0x4d   :  { %557 = vmatpush.bf16.msrb.mxu3 %v821_v13  ;;  %519 = vmatmul.bf16.vlgmr.msrb.gmra.mxu0 %v1068_v59 }
  0x4e   :  { %532 = vmatmul.bf16.vlgmr.msrb.gmra.mxu1 %v1072_v62 }
  0x4f   :  { %545 = vmatmul.bf16.vlgmr.msrb.gmra.mxu2 %v1066_v56 }
  0x50   :  { %558 = vmatmul.bf16.vlgmr.msrb.gmra.mxu3 %v1070_v60 }
  0xaa   :  { %v468_v16 = vpop.f32.mrf.mxu0 }
  0xab   :  { %v469_v17 = vadd.f32 %v468_v16, %v121_v15  ;;  %v481_v18 = vpop.f32.mrf.mxu1 }
  0xad   :  { %v482_v19 = vadd.f32 %v481_v18, %v469_v17 }
  0xb2   :  { %v494_v59 = vpop.f32.mrf.mxu2  ;;  %v470_v22 = vpop.f32.mrf.mxu0 }
  0xb3   :  { %v495_v62 = vadd.f32 %v494_v59, %v482_v19  ;;  %v507_v21 = vpop.f32.mrf.mxu3  ;;  %v483_v60 = vpop.f32.mrf.mxu1 }
  0xb5   :  { %v508_v56 = vadd.f32 %v507_v21, %v495_v62 }
  0xb7   :  { %v563_v23 = vmax.f32 %v508_v56, 0.0 }
  0xb9   :  { %v566_v24 = vpack.c.bf16 %v563_v23, %v563_v23 }
  0xba   :  { %v496_v25 = vpop.f32.mrf.mxu2 }
  0xbb   :  { %v509_v26 = vpop.f32.mrf.mxu3  ;;  %583 = vmatpush.bf16.xpose.msra.mxu0 %v566_v24 }
  0xc2   :  { %584 = vmatmul.bf16.vlgmr.msra.gmra.mxu0 %v572_v27 }
  0xca   :  { %v520_v29 = vpop.f32.mrf.mxu0 }
  0xcb   :  { %v521_v30 = vadd.f32 %v520_v29, %v122_v28  ;;  %v533_v31 = vpop.f32.mrf.mxu1 }
  0xcd   :  { %v534_v32 = vadd.f32 %v533_v31, %v521_v30 }
  0xd2   :  { %v546_v33 = vpop.f32.mrf.mxu2  ;;  %v522_v36 = vpop.f32.mrf.mxu0 }
  0xd3   :  { %v547_v34 = vadd.f32 %v546_v33, %v534_v32  ;;  %v559_v35 = vpop.f32.mrf.mxu3  ;;  %v535_v37 = vpop.f32.mrf.mxu1 }
  0xd5   :  { %v560_v38 = vadd.f32 %v559_v35, %v547_v34 }
  0xd7   :  { %v564_v39 = vmax.f32 %v560_v38, 0.0 }
  0xd9   :  { %v567_v40 = vpack.c.bf16 %v564_v39, %v564_v39 }
  0xda   :  { %v548_v41 = vpop.f32.mrf.mxu2 }
  0xdb   :  { %v561_v42 = vpop.f32.mrf.mxu3  ;;  %596 = vmatpush.bf16.xpose.msra.mxu1 %v567_v40 }
  0xe2   :  { %597 = vmatmul.bf16.vlgmr.msra.gmra.mxu1 %v573_v43 }
 0x13f   :  { %v585_v44 = vpop.f32.mrf.mxu0 }
 0x140   :  { %v586_v47 = vadd.f32 %v585_v44, %v569_v46 }
 0x147   :  { %v587_v45 = vpop.f32.mrf.mxu0 }
 0x15f   :  { %v598_v48 = vpop.f32.mrf.mxu1 }
 0x160   :  { %v599_v49 = vadd.f32 %v598_v48, %v586_v47 }
 0x162   :  { %603 = vst.msk [vmem:[#allocation8] sm:$0x1] %vm602_vm0, %v599_v49 }
 0x163   :  { %614 = dma.vmem_to_hbm [thread:$0]  %s610_s8, 16, %s612_s11, [#allocation5]  }
 0x167   :  { %v600_v50 = vpop.f32.mrf.mxu1 }
 0x168   :  { %1023 = dma.done.wait [#allocation5], 16  }
 0x169   :  { %1024 = vsyncadd [#allocation5], 4294967280 }
 0x16a   :  { %619 = vsyncpa [#allocation4], 1 }
 0x16b   :  { %620 = vsyncpa [#allocation7], 1 }
 0x16c   :  { %621 = vsyncpa [#allocation5], 1 }

</bundles_post_ra>
